<compile_context>
chip_gen: v5e
topology: v5e:2x2
jax: 0.10.0
libtpu: 0.0.40
codegen_flags: <defaults>
</compile_context>

<pallas_src>
import functools

import jax
import jax.numpy as jnp
from jax.experimental import pallas as pl
from jax.experimental.pallas import tpu as pltpu

_TARGET_PRED_BLOCK_BYTES = 8 * 1024 * 1024     # ~8 MiB of pred per grid step
_MAX_STREAM_WORKSET_BYTES = 40 * 1024 * 1024   # 2 bufs x (pred+targ+mask) cap
_VMEM_LIMIT_CAP_BYTES = 56 * 1024 * 1024       # < v7x's 64 MiB physical VMEM


# --------------------------------------------------------------------------- #
# Kernel bodies
# --------------------------------------------------------------------------- #
def _iou_tile_losses(pred_ref, targ_ref, hw):
    """Per-position IOU loss for one (rows, 4*hw) block -> (rows, hw) float32."""
    p = pred_ref[...].astype(jnp.float32)     # in-kernel upcast (bf16 inputs ok)
    t = targ_ref[...].astype(jnp.float32)
    # channel convention (matches IOULoss): 0=left, 1=right, 2=top, 3=bottom
    p_l, p_r = p[:, 0 * hw:1 * hw], p[:, 1 * hw:2 * hw]
    p_t, p_b = p[:, 2 * hw:3 * hw], p[:, 3 * hw:4 * hw]
    t_l, t_r = t[:, 0 * hw:1 * hw], t[:, 1 * hw:2 * hw]
    t_t, t_b = t[:, 2 * hw:3 * hw], t[:, 3 * hw:4 * hw]

    target_area = (t_l + t_r) * (t_t + t_b)
    pred_area = (p_l + p_r) * (p_t + p_b)
    w_int = jnp.minimum(p_l, t_l) + jnp.minimum(p_r, t_r)
    h_int = jnp.minimum(p_b, t_b) + jnp.minimum(p_t, t_t)
    area_i = w_int * h_int
    area_u = target_area + pred_area - area_i
    # -log((ai+1)/(au+1)) == log(au+1) - log(ai+1): two EUP logs, no f32 divide.
    return jnp.log(area_u + 1.0) - jnp.log(area_i + 1.0)


def _row_partial(x, bn, hw, acc_rows):
    """(bn, hw) -> (acc_rows, hw): sum groups of rows (layout-natural, VALU only)."""
    if acc_rows == bn:
        return x
    return x.reshape(bn // acc_rows, acc_rows, hw).sum(axis=0)


def _iou_kernel_nomask(pred_ref, targ_ref, lsum_ref, lacc_ref, *,
                       hw, bn, acc_rows, n_rows, nbj, needs_row_mask):
    c = pl.program_id(0)          # optional core-split axis ("parallel")
    j = pl.program_id(1)          # row-block reduction axis ("arbitrary")

    @pl.when(j == 0)
    def _init():
        lacc_ref[...] = jnp.zeros_like(lacc_ref)

    losses = _iou_tile_losses(pred_ref, targ_ref, hw)

    if needs_row_mask:
        row0 = (c * nbj + j) * bn
        is_partial = row0 + bn > n_rows

        @pl.when(is_partial)      # at most one partial block per core
        def _tail():
            rows = jax.lax.broadcasted_iota(jnp.int32, (bn, hw), 0)
            masked = jnp.where(rows < (n_rows - row0), losses, 0.0)
            lacc_ref[...] += _row_partial(masked, bn, hw, acc_rows)

        @pl.when(row0 + bn <= n_rows)
        def _full():
            lacc_ref[...] += _row_partial(losses, bn, hw, acc_rows)
    else:
        lacc_ref[...] += _row_partial(losses, bn, hw, acc_rows)

    @pl.when(j == nbj - 1)
    def _finalize():
        lsum_ref[...] = jnp.broadcast_to(jnp.sum(lacc_ref[...]), (1, 8, 128))


def _iou_kernel_masked(pred_ref, targ_ref, mask_ref, lsum_ref, wsum_ref,
                       lacc_ref, wacc_ref, *,
                       hw, bn, acc_rows, n_rows, nbj, needs_row_mask):
    c = pl.program_id(0)
    j = pl.program_id(1)

    @pl.when(j == 0)
    def _init():
        lacc_ref[...] = jnp.zeros_like(lacc_ref)
        wacc_ref[...] = jnp.zeros_like(wacc_ref)

    losses = _iou_tile_losses(pred_ref, targ_ref, hw)
    mv = mask_ref[...]                                   # bool / int8 / uint8
    sel = mv if mv.dtype == jnp.bool_ else (mv != 0)

    def _accumulate(keep):
        # Mask is applied BEFORE the pre-reduction (garbage/ragged rows and
        # masked-out positions never reach the sums).
        lacc_ref[...] += _row_partial(jnp.where(keep, losses, 0.0), bn, hw, acc_rows)
        wacc_ref[...] += _row_partial(keep.astype(jnp.float32), bn, hw, acc_rows)

    if needs_row_mask:
        row0 = (c * nbj + j) * bn
        is_partial = row0 + bn > n_rows

        @pl.when(is_partial)
        def _tail():
            rows = jax.lax.broadcasted_iota(jnp.int32, (bn, hw), 0)
            _accumulate(jnp.logical_and(sel, rows < (n_rows - row0)))

        @pl.when(row0 + bn <= n_rows)
        def _full():
            _accumulate(sel)
    else:
        _accumulate(sel)

    @pl.when(j == nbj - 1)
    def _finalize():
        lsum_ref[...] = jnp.broadcast_to(jnp.sum(lacc_ref[...]), (1, 8, 128))
        wsum_ref[...] = jnp.broadcast_to(jnp.sum(wacc_ref[...]), (1, 8, 128))


# --------------------------------------------------------------------------- #
# Block sizing / VMEM budgeting
# --------------------------------------------------------------------------- #
def _row_align(itemsize, has_mask):
    """Sublane-tile alignment for the row (second-minor) block dim."""
    a = max(8, 32 // max(int(itemsize), 1))   # f32 -> 8, bf16 -> 16, 8-bit -> 32
    if has_mask:
        a = max(a, 32)                        # byte-wide mask tiles as (32, 128)
    return a


def _pick_block_rows(n, hw, itemsize, has_mask):
    """Rows per block: ~8 MiB of pred per step, working set capped for v7x."""
    align = _row_align(itemsize, has_mask)
    pred_row_bytes = 4 * hw * itemsize
    stream_row_bytes = 2 * pred_row_bytes + (hw if has_mask else 0)
    bn_target = _TARGET_PRED_BLOCK_BYTES // pred_row_bytes
    bn_cap = _MAX_STREAM_WORKSET_BYTES // (2 * stream_row_bytes)
    bn = max(align, (min(bn_target, bn_cap) // align) * align)
    if n <= bn:
        return n                               # single full-extent row block
    return bn


def _vmem_limit_bytes(bn, hw, itemsize, has_mask, acc_rows):
    block = bn * 4 * hw * itemsize             # one input block
    mask_block = bn * hw if has_mask else 0
    workset = 2 * (2 * block + mask_block)     # double-buffered streams
    scratch = acc_rows * hw * 4 * (2 if has_mask else 1)
    limit = workset + scratch + (4 << 20)      # headroom: out blocks + temporaries
    return int(min(max(limit, 16 << 20), _VMEM_LIMIT_CAP_BYTES))


# --------------------------------------------------------------------------- #
# pallas_call plumbing
# --------------------------------------------------------------------------- #
def _partial_sums(pred2d, targ2d, mask2d, bn, num_cores):
    """Returns (sum(loss * keep), sum(keep)) partials over all positions."""
    n, four_hw = pred2d.shape
    hw = four_hw // 4
    nb = pl.cdiv(n, bn)                        # total row blocks
    nbj = pl.cdiv(nb, num_cores)               # row blocks per core
    needs_row_mask = (num_cores * nbj * bn != n)
    acc_rows = 8 if bn % 8 == 0 else bn
    has_mask = mask2d is not None
    itemsize = max(jnp.dtype(pred2d.dtype).itemsize,
                   jnp.dtype(targ2d.dtype).itemsize)

    def in_map(c, j):
        # Clamp fully-out-of-range blocks (their rows are masked in-kernel).
        return (jnp.minimum(c * nbj + j, nb - 1), 0)

    out_shape = jax.ShapeDtypeStruct((num_cores, 8, 128), jnp.float32)
    out_spec = pl.BlockSpec((1, 8, 128), lambda c, j: (c, 0, 0))
    compiler_params = pltpu.CompilerParams(
        dimension_semantics=("parallel", "arbitrary"),
        vmem_limit_bytes=_vmem_limit_bytes(bn, hw, itemsize, has_mask, acc_rows))

    io_bytes = ((pred2d.size + targ2d.size) * itemsize
                + (mask2d.size if has_mask else 0)
                + num_cores * 8 * 128 * 4 * (2 if has_mask else 1))
    cost = pl.CostEstimate(flops=13 * n * hw, transcendentals=2 * n * hw,
                           bytes_accessed=int(io_bytes))

    common = dict(hw=hw, bn=bn, acc_rows=acc_rows, n_rows=n, nbj=nbj,
                  needs_row_mask=needs_row_mask)

    if not has_mask:
        lsum = pl.pallas_call(
            functools.partial(_iou_kernel_nomask, **common),
            out_shape=out_shape,
            grid_spec=pltpu.PrefetchScalarGridSpec(
                num_scalar_prefetch=0,
                grid=(num_cores, nbj),
                in_specs=[pl.BlockSpec((bn, 4 * hw), in_map),
                          pl.BlockSpec((bn, 4 * hw), in_map)],
                out_specs=out_spec,
                scratch_shapes=[pltpu.VMEM((acc_rows, hw), jnp.float32)]),
            compiler_params=compiler_params,
            cost_estimate=cost,
        )(pred2d, targ2d)
        return jnp.sum(lsum[:, 0, 0]), None

    lsum, wsum = pl.pallas_call(
        functools.partial(_iou_kernel_masked, **common),
        out_shape=(out_shape, out_shape),
        grid_spec=pltpu.PrefetchScalarGridSpec(
            num_scalar_prefetch=0,
            grid=(num_cores, nbj),
            in_specs=[pl.BlockSpec((bn, 4 * hw), in_map),
                      pl.BlockSpec((bn, 4 * hw), in_map),
                      pl.BlockSpec((bn, hw), in_map)],
            out_specs=(out_spec, out_spec),
            scratch_shapes=[pltpu.VMEM((acc_rows, hw), jnp.float32),
                            pltpu.VMEM((acc_rows, hw), jnp.float32)]),
        compiler_params=compiler_params,
        cost_estimate=cost,
    )(pred2d, targ2d, mask2d)
    return jnp.sum(lsum[:, 0, 0]), jnp.sum(wsum[:, 0, 0])


@functools.partial(jax.jit, static_argnames=("dim", "block_rows", "num_cores"))
def reg_loss_v2(output, target, mask=None, dim=4, block_rows=None, num_cores=1):
    """JAX/Pallas equivalent of REGLossV2(loss_type='iou', reduction='mean').

    output/target: any shape that row-major-reshapes to (-1, dim, H, W).
    mask: optional, row-major-reshapes to (-1, H, W); nonzero/True = use position.
    block_rows (static): rows-per-block override (must respect dtype alignment
      or be >= the number of rows).
    num_cores (static): leading "parallel" grid axis (2 on v7x to split across
      both TensorCores; leave at 1 on single-TC v5e/v6e).
    """
    assert dim == 4, "IOU loss requires dim == 4"
    hw = output.shape[-1] * output.shape[-2]
    n = output.size // (dim * hw)
    if n == 0 or hw == 0:
        raise ValueError("REGLossV2: empty input (losses.numel() == 0)")

    pred = output.reshape(n, dim * hw)        # free row-major reshape (no HBM pass)
    targ = target.reshape(n, dim * hw)

    has_mask = mask is not None
    itemsize = max(jnp.dtype(output.dtype).itemsize,
                   jnp.dtype(target.dtype).itemsize)
    if block_rows is None:
        bn = _pick_block_rows(n, hw, itemsize, has_mask)
    else:
        bn = min(int(block_rows), n)
        align = _row_align(itemsize, has_mask)
        if bn < n and bn % align != 0:
            raise ValueError(
                f"block_rows must be a multiple of {align} (or >= number of rows)")

    if has_mask:
        m = mask.reshape(n, hw)
        if jnp.dtype(m.dtype).itemsize != 1:
            m = m.astype(jnp.int8)            # byte-wide masks stream as-is
        lsum, wsum = _partial_sums(pred, targ, m, bn, num_cores)
        # TODO(synk): an all-False mask gives 0/0 (NaN); PyTorch asserts instead.
        return lsum / wsum
    lsum, _ = _partial_sums(pred, targ, None, bn, num_cores)
    return lsum / jnp.float32(n * hw)


# --------------- pure-JAX reference (mirrors the PyTorch code) --------------- #
def _reference(output, target, mask=None, dim=4):
    hw = output.shape[-1] * output.shape[-2]
    o = output.reshape(-1, dim, hw).astype(jnp.float32)
    t = target.reshape(-1, dim, hw).astype(jnp.float32)
    p_l, p_r, p_t, p_b = o[:, 0], o[:, 1], o[:, 2], o[:, 3]
    t_l, t_r, t_t, t_b = t[:, 0], t[:, 1], t[:, 2], t[:, 3]
    target_area = (t_l + t_r) * (t_t + t_b)
    pred_area = (p_l + p_r) * (p_t + p_b)
    w_i = jnp.minimum(p_l, t_l) + jnp.minimum(p_r, t_r)
    h_i = jnp.minimum(p_b, t_b) + jnp.minimum(p_t, t_t)
    a_i = w_i * h_i
    a_u = target_area + pred_area - a_i
    losses = -jnp.log((a_i + 1.0) / (a_u + 1.0))
    if mask is not None:
        mw = (mask.reshape(losses.shape) != 0).astype(jnp.float32)
        return jnp.sum(losses * mw) / jnp.sum(mw)
    return jnp.mean(losses)


if __name__ == "__main__":
    key = jax.random.PRNGKey(0)
    ks = jax.random.split(key, 6)

    def check(got, want, tol=1e-5):
        got = jax.block_until_ready(got)
        assert jnp.allclose(got, want, rtol=tol, atol=tol), (got, want)

    # Small demo shapes: (batch=2, dim=4, 16, 16); positive edge-distance maps.
    out_s = jax.random.uniform(ks[0], (2, 4, 16, 16), jnp.float32, 0.1, 2.0)
    tgt_s = jax.random.uniform(ks[1], (2, 4, 16, 16), jnp.float32, 0.1, 2.0)
    msk_s = jax.random.uniform(ks[2], (2, 16, 16)) > 0.5

    check(reg_loss_v2(out_s, tgt_s), _reference(out_s, tgt_s))
    check(reg_loss_v2(out_s, tgt_s, msk_s), _reference(out_s, tgt_s, msk_s))

    # Multi-block rows, ragged tail, runtime-gated tail masking (72 rows, 32/block).
    out_m = jax.random.uniform(ks[3], (72, 4, 16, 16), jnp.float32, 0.1, 2.0)
    tgt_m = jax.random.uniform(ks[4], (72, 4, 16, 16), jnp.float32, 0.1, 2.0)
    msk_m = jax.random.uniform(ks[5], (72, 16, 16)) > 0.3

    check(reg_loss_v2(out_m, tgt_m, block_rows=32), _reference(out_m, tgt_m))
    check(reg_loss_v2(out_m, tgt_m, msk_m, block_rows=32),
          _reference(out_m, tgt_m, msk_m))
    # int8 mask streamed as-is (no wrapper cast pass).
    check(reg_loss_v2(out_m, tgt_m, msk_m.astype(jnp.int8), block_rows=32),
          _reference(out_m, tgt_m, msk_m))

    # Optional 2-way core split (intended for v7x); exercises block-index
    # clamping and the fully-out-of-range masked block on any chip.
    check(reg_loss_v2(out_m, tgt_m, block_rows=32, num_cores=2),
          _reference(out_m, tgt_m))
    check(reg_loss_v2(out_m, tgt_m, msk_m, block_rows=32, num_cores=2),
          _reference(out_m, tgt_m, msk_m))

    # bf16 inputs exercise dtype-aware block sizing and the in-kernel upcast.
    check(reg_loss_v2(out_s.astype(jnp.bfloat16), tgt_s.astype(jnp.bfloat16)),
          _reference(out_s.astype(jnp.bfloat16), tgt_s.astype(jnp.bfloat16)),
          tol=1e-3)

    print("KERNEL_OK")
</pallas_src>

<mosaic_0001>
module attributes {stable_mosaic.version = 11 : i64} {
  func.func @_iou_kernel_nomask(%arg0: i32, %arg1: i32, %arg2: memref<2x1024xf32, #tpu.memory_space<vmem>>, %arg3: memref<2x1024xf32, #tpu.memory_space<vmem>>, %arg4: memref<1x8x128xf32, #tpu.memory_space<vmem>>, %arg5: memref<2x256xf32, #tpu.memory_space<vmem>>) attributes {dimension_semantics = [#tpu.dimension_semantics<parallel>, #tpu.dimension_semantics<arbitrary>], iteration_bounds = array<i64: 1, 1>, scalar_prefetch = 0 : i64, scratch_operands = 1 : i64, tpu.core_type = #tpu.core_type<tc>, window_params = [{transform_indices = @transform_0, window_bounds = array<i64: 2, 1024>}, {transform_indices = @transform_1, window_bounds = array<i64: 2, 1024>}, {transform_indices = @transform_2, window_bounds = array<i64: 1, 8, 128>}]} {
    %c0_i32 = arith.constant 0 : i32
    %0 = arith.cmpi eq, %arg1, %c0_i32 : i32
    %1 = arith.extui %0 : i1 to i32
    %c0_i32_0 = arith.constant 0 : i32
    %2 = arith.cmpi ne, %1, %c0_i32_0 : i32
    scf.if %2 {
      %cst_11 = arith.constant 0.000000e+00 : f32
      %41 = vector.broadcast %cst_11 : f32 to vector<2x256xf32>
      %c0_12 = arith.constant 0 : index
      %c0_13 = arith.constant 0 : index
      %42 = vector.load %arg5[%c0_12, %c0_13] : memref<2x256xf32, #tpu.memory_space<vmem>>, vector<2x256xf32>
      tpu.vector_store %arg5[%c0_12, %c0_13], %41 {strides = array<i32>} : memref<2x256xf32, #tpu.memory_space<vmem>>, vector<2x256xf32>,
    } else {
    }
    %c0 = arith.constant 0 : index
    %c0_1 = arith.constant 0 : index
    %3 = vector.load %arg2[%c0, %c0_1] : memref<2x1024xf32, #tpu.memory_space<vmem>>, vector<2x1024xf32>
    %c0_2 = arith.constant 0 : index
    %c0_3 = arith.constant 0 : index
    %4 = vector.load %arg3[%c0_2, %c0_3] : memref<2x1024xf32, #tpu.memory_space<vmem>>, vector<2x1024xf32>
    %5 = vector.extract_strided_slice %3 {offsets = [0, 0], sizes = [2, 256], strides = [1, 1]} : vector<2x1024xf32> to vector<2x256xf32>
    %6 = vector.extract_strided_slice %3 {offsets = [0, 256], sizes = [2, 256], strides = [1, 1]} : vector<2x1024xf32> to vector<2x256xf32>
    %7 = vector.extract_strided_slice %3 {offsets = [0, 512], sizes = [2, 256], strides = [1, 1]} : vector<2x1024xf32> to vector<2x256xf32>
    %8 = vector.extract_strided_slice %3 {offsets = [0, 768], sizes = [2, 256], strides = [1, 1]} : vector<2x1024xf32> to vector<2x256xf32>
    %9 = vector.extract_strided_slice %4 {offsets = [0, 0], sizes = [2, 256], strides = [1, 1]} : vector<2x1024xf32> to vector<2x256xf32>
    %10 = vector.extract_strided_slice %4 {offsets = [0, 256], sizes = [2, 256], strides = [1, 1]} : vector<2x1024xf32> to vector<2x256xf32>
    %11 = vector.extract_strided_slice %4 {offsets = [0, 512], sizes = [2, 256], strides = [1, 1]} : vector<2x1024xf32> to vector<2x256xf32>
    %12 = vector.extract_strided_slice %4 {offsets = [0, 768], sizes = [2, 256], strides = [1, 1]} : vector<2x1024xf32> to vector<2x256xf32>
    %13 = arith.addf %9, %10 : vector<2x256xf32>
    %14 = arith.addf %11, %12 : vector<2x256xf32>
    %15 = arith.mulf %13, %14 : vector<2x256xf32>
    %16 = arith.addf %5, %6 : vector<2x256xf32>
    %17 = arith.addf %7, %8 : vector<2x256xf32>
    %18 = arith.mulf %16, %17 : vector<2x256xf32>
    %19 = arith.minimumf %5, %9 : vector<2x256xf32>
    %20 = arith.minimumf %6, %10 : vector<2x256xf32>
    %21 = arith.addf %19, %20 : vector<2x256xf32>
    %22 = arith.minimumf %8, %12 : vector<2x256xf32>
    %23 = arith.minimumf %7, %11 : vector<2x256xf32>
    %24 = arith.addf %22, %23 : vector<2x256xf32>
    %25 = arith.mulf %21, %24 : vector<2x256xf32>
    %26 = arith.addf %15, %18 : vector<2x256xf32>
    %27 = arith.subf %26, %25 : vector<2x256xf32>
    %cst = arith.constant 1.000000e+00 : f32
    %28 = vector.broadcast %cst : f32 to vector<2x256xf32>
    %29 = arith.addf %27, %28 : vector<2x256xf32>
    %30 = math.log %29 : vector<2x256xf32>
    %cst_4 = arith.constant 1.000000e+00 : f32
    %31 = vector.broadcast %cst_4 : f32 to vector<2x256xf32>
    %32 = arith.addf %25, %31 : vector<2x256xf32>
    %33 = math.log %32 : vector<2x256xf32>
    %34 = arith.subf %30, %33 : vector<2x256xf32>
    %c0_5 = arith.constant 0 : index
    %c0_6 = arith.constant 0 : index
    %35 = vector.load %arg5[%c0_5, %c0_6] : memref<2x256xf32, #tpu.memory_space<vmem>>, vector<2x256xf32>
    %36 = arith.addf %35, %34 : vector<2x256xf32>
    %c0_7 = arith.constant 0 : index
    %c0_8 = arith.constant 0 : index
    %37 = vector.load %arg5[%c0_7, %c0_8] : memref<2x256xf32, #tpu.memory_space<vmem>>, vector<2x256xf32>
    tpu.vector_store %arg5[%c0_7, %c0_8], %36 {strides = array<i32>} : memref<2x256xf32, #tpu.memory_space<vmem>>, vector<2x256xf32>,
    %c0_i32_9 = arith.constant 0 : i32
    %38 = arith.cmpi eq, %arg1, %c0_i32_9 : i32
    %39 = arith.extui %38 : i1 to i32
    %c0_i32_10 = arith.constant 0 : i32
    %40 = arith.cmpi ne, %39, %c0_i32_10 : i32
    scf.if %40 {
      %c0_11 = arith.constant 0 : index
      %c0_12 = arith.constant 0 : index
      %41 = vector.load %arg5[%c0_11, %c0_12] : memref<2x256xf32, #tpu.memory_space<vmem>>, vector<2x256xf32>
      %42 = vector.shape_cast %41 : vector<2x256xf32> to vector<1x2x256xf32>
      %cst_13 = arith.constant dense<0.000000e+00> : vector<1xf32>
      %43 = vector.multi_reduction <add>, %42, %cst_13 [1, 2] : vector<1x2x256xf32> to vector<1xf32>
      %44 = vector.shape_cast %43 : vector<1xf32> to vector<1x1x1xf32>
      %45 = vector.extract %44[0, 0, 0] : f32 from vector<1x1x1xf32>
      %46 = vector.broadcast %45 : f32 to vector<1x8x128xf32>
      %c0_14 = arith.constant 0 : index
      %c0_15 = arith.constant 0 : index
      %c0_16 = arith.constant 0 : index
      %47 = vector.load %arg4[%c0_14, %c0_15, %c0_16] : memref<1x8x128xf32, #tpu.memory_space<vmem>>, vector<1x8x128xf32>
      tpu.vector_store %arg4[%c0_14, %c0_15, %c0_16], %46 {strides = array<i32>} : memref<1x8x128xf32, #tpu.memory_space<vmem>>, vector<1x8x128xf32>,
    } else {
    }
    return
  }
  func.func @transform_0(%arg0: i32, %arg1: i32) -> (i32, i32) {
    %c1_i32 = arith.constant 1 : i32
    %0 = arith.muli %arg0, %c1_i32 : i32
    %1 = arith.addi %0, %arg1 : i32
    %c0_i32 = arith.constant 0 : i32
    %2 = arith.minsi %1, %c0_i32 : i32
    %c0_i32_0 = arith.constant 0 : i32
    %c0_i32_1 = arith.constant 0 : i32
    return %2, %c0_i32_0 : i32, i32
  }
  func.func @transform_1(%arg0: i32, %arg1: i32) -> (i32, i32) {
    %c1_i32 = arith.constant 1 : i32
    %0 = arith.muli %arg0, %c1_i32 : i32
    %1 = arith.addi %0, %arg1 : i32
    %c0_i32 = arith.constant 0 : i32
    %2 = arith.minsi %1, %c0_i32 : i32
    %c0_i32_0 = arith.constant 0 : i32
    %c0_i32_1 = arith.constant 0 : i32
    return %2, %c0_i32_0 : i32, i32
  }
  func.func @transform_2(%arg0: i32, %arg1: i32) -> (i32, i32, i32) {
    %c0_i32 = arith.constant 0 : i32
    %c0_i32_0 = arith.constant 0 : i32
    %c0_i32_1 = arith.constant 0 : i32
    return %arg0, %c0_i32, %c0_i32_0 : i32, i32, i32
  }
}

</mosaic_0001>

<bundles_post_ra>
// kernel: reg_loss_v2.1
= control target key start
LH: loop header
LB: loop body
LE: loop exit
PB: predicated region body
PF: predicated region fallthrough
CT: control target
= control target key end

     0   :  { %v165_v0 = vmov 0.0   ;;  %vm127_vm0 = vcmask 1041408   ;;  %s196_s0 = inlined_call_operand.vmem [shape: f32[2,1024], index: 0, kind: input, shape index: {}]   ;;  %s197_s1 = inlined_call_operand.vmem [shape: f32[2,1024], index: 1, kind: input, shape index: {}]   ;;  %s198_s2 = inlined_call_operand.vmem [shape: f32[1,8,128], index: 2, kind: output, shape index: {}]  }
   0x1   :  { %75 = vst [vmem:[#allocation2] sm:$0xf] %v165_v0  ;;  %v76_v1 = vld [vmem:[%s196_s0] sm:$0xff]  ;;  %v77_v2 = vld [vmem:[%s196_s0 + $0x8] sm:$0xff] }
   0x2   :  { %v78_v3 = vld [vmem:[%s197_s1] sm:$0xff]  ;;  %v79_v4 = vld [vmem:[%s197_s1 + $0x8] sm:$0xff]  ;;  %v90_v6 = vrot.slane %v76_v1, 4  ;;  %v94_v7 = vrot.slane %v77_v2, 4 }
   0x3   :  { %v81_v5 = vrot.slane %v78_v3, 4  ;;  %v98_v8 = vmin.f32 %v76_v1, %v78_v3  ;;  %v85_v9 = vrot.slane %v79_v4, 4  ;;  %v102_v10 = vmin.f32 %v77_v2, %v79_v4 }
   0x4   :  { %v92_v12 = vadd.f32 %v90_v6, %v76_v1  ;;  %v96_v13 = vadd.f32 %v94_v7, %v77_v2 }
   0x5   :  { %v83_v11 = vadd.f32 %v81_v5, %v78_v3  ;;  %v99_v14 = vmin.f32 %v90_v6, %v81_v5  ;;  %v87_v15 = vadd.f32 %v85_v9, %v79_v4  ;;  %v101_v16 = vmin.f32 %v94_v7, %v85_v9 }
   0x6   :  { %v97_v17 = vmul.f32 %v96_v13, %v92_v12 }
   0x7   :  { %v100_v18 = vadd.f32 %v99_v14, %v98_v8  ;;  %v88_v19 = vmul.f32 %v87_v15, %v83_v11  ;;  %v103_v20 = vadd.f32 %v102_v10, %v101_v16 }
   0x8   :  { %v114_v30 = vld [vmem:[#allocation2] sm:$0xf] }
   0x9   :  { %v104_v21 = vmul.f32 %v103_v20, %v100_v18  ;;  %v105_v22 = vadd.f32 %v97_v17, %v88_v19 }
   0xb   :  { %v106_v23 = vsub.f32 %v105_v22, %v104_v21  ;;  %v110_v24 = vadd.f32 1.0, %v104_v21 }
   0xd   :  { %v107_v25 = vadd.f32 1.0, %v106_v23  ;;  %161 = vlog2.f32 %v110_v24 }
   0xf   :  { %163 = vlog2.f32 %v107_v25 }
  0x13   :  { %v162_v26 = vpop.eup %161 }
  0x14   :  { %v112_v27 = vmul.f32 0.6931472, %v162_v26 }
  0x15   :  { %v164_v28 = vpop.eup %163 }
  0x16   :  { %v109_v29 = vmul.f32 0.6931472, %v164_v28 }
  0x18   :  { %v113_v31 = vsub.f32 %v109_v29, %v112_v27 }
  0x1a   :  { %v115_v32 = vadd.f32 %v114_v30, %v113_v31 }
  0x1c   :  { %116 = vst [vmem:[#allocation2] sm:$0xf] %v115_v32 }
  0x23   :  { %v120_v33 = vld [vmem:[#allocation2] sm:$0xf] }
  0x24   :  { %122 = vst [vmem:[#allocation1] ss:$4 sm:$0xff] %v120_v33 }
  0x2b   :  { %v123_v34 = vld.sshfl [vmem:[#allocation1] sm:$0xff pattern:$0x73625140]  ;;  %v124_v35 = vld.sshfl [vmem:[#allocation1 + $0x8] sm:$0xff pattern:$0x73625140] }
  0x2c   :  { %v128_v36 = vsel %vm127_vm0, %v123_v34, 0.0  ;;  %v129_v37 = vsel %vm127_vm0, %v124_v35, 0.0 }
  0x2d   :  { %v130_v38 = vadd.f32 %v129_v37, %v128_v36 }
  0x2f   :  { %131 = vadd.xlane.f32.xlu0 %v130_v38 }
  0xa2   :  { %v132_v39 = vpop.xlane.xlu0 %131 }
  0xa3   :  { %v133_v40 = vrot.slane %v132_v39, 4 }
  0xa5   :  { %v134_v41 = vadd.f32 %v133_v40, %v132_v39 }
  0xa7   :  { %v135_v42 = vrot.slane %v134_v41, 2 }
  0xa9   :  { %v136_v43 = vadd.f32 %v135_v42, %v134_v41 }
  0xab   :  { %v137_v44 = vrot.slane %v136_v43, 1 }
  0xad   :  { %v138_v45 = vadd.f32 %v137_v44, %v136_v43 }
  0xaf   :  { %158 = vpush %v138_v45 }
  0xe0   :  { %s159_s0 = spop %158 }
  0xe1   :  { %v140_v46 = vstv %s159_s0 }
  0xe2   :  { %141 = vst [vmem:[%s198_s2] sm:$0xff] %v140_v46 }

</bundles_post_ra>
